<compile_context>
chip_gen: v6e
topology: v6e:2x2x1
jax: 0.10.0
libtpu: 0.0.40
codegen_flags: <defaults>
</compile_context>

<pallas_src>
import functools

import jax
import jax.numpy as jnp
from jax.experimental import pallas as pl
from jax.experimental.pallas import tpu as pltpu


def _round_up(x, m):
    return ((x + m - 1) // m) * m


def mlp_kernel(x_ref, w1_ref, b1_ref, w2_ref, b2_ref, o_ref, *,
               use_bf16_matmul, do_skip_connection):
    # x_ref: (TILE_B, K)   streamed per grid step
    # w1_ref/(b1_ref): (K, N)/(1, N)   VMEM-resident across steps
    # w2_ref/(b2_ref): (N, N)/(1, N)   VMEM-resident across steps
    x = x_ref[...]
    w1 = w1_ref[...]
    w2 = w2_ref[...]

    if use_bf16_matmul:
        x_mm, w1_mm = x.astype(jnp.bfloat16), w1.astype(jnp.bfloat16)
    else:
        x_mm, w1_mm = x, w1

    # after_first_layer = dropout(x) @ W1 + b1   (dropout = identity in eval mode)
    h = jnp.dot(x_mm, w1_mm, preferred_element_type=jnp.float32) + b1_ref[...]

    # tanh on the VPU/EUP in f32 (v5e has no bf16 elementwise path anyway).
    t = jnp.tanh(h)

    if use_bf16_matmul:
        t_mm, w2_mm = t.astype(jnp.bfloat16), w2.astype(jnp.bfloat16)
    else:
        t_mm, w2_mm = t, w2

    y = jnp.dot(t_mm, w2_mm, preferred_element_type=jnp.float32) + b2_ref[...]

    # skip connection: out = y + after_first_layer (pre-tanh), per the module.
    out = y + h if do_skip_connection else y
    o_ref[...] = out.astype(o_ref.dtype)


def mlp_forward(x, w1, b1, w2, b2, *, tile_b=256, use_bf16_matmul=False,
                do_skip_connection=True):
    B, in_dim = x.shape
    hidden = w1.shape[1]
    assert w1.shape == (in_dim, hidden)
    assert w2.shape == (hidden, hidden)

    dt = x.dtype
    b1 = jnp.reshape(b1, (1, hidden)).astype(dt)
    b2 = jnp.reshape(b2, (1, hidden)).astype(dt)

    # Lane-align K / N to 128 (unmasked MXU passes and lane-dense stores);
    # batch tile is a multiple of the 8-sublane granule.
    K = _round_up(in_dim, 128)
    N = _round_up(hidden, 128)
    tb = min(tile_b, _round_up(B, 8))
    Bp = _round_up(B, tb)

    # Zero-padding keeps the math exact: padded K columns/rows contribute 0,
    # padded N columns stay 0 through tanh and the second matmul and are
    # sliced off at the end.
    x_p = jnp.zeros((Bp, K), dt).at[:B, :in_dim].set(x)
    w1_p = jnp.zeros((K, N), dt).at[:in_dim, :hidden].set(w1.astype(dt))
    b1_p = jnp.zeros((1, N), dt).at[:, :hidden].set(b1)
    w2_p = jnp.zeros((N, N), dt).at[:hidden, :hidden].set(w2.astype(dt))
    b2_p = jnp.zeros((1, N), dt).at[:, :hidden].set(b2)

    grid = (Bp // tb,)
    itemsize = jnp.dtype(dt).itemsize

    # VMEM budget: resident weights (x2 safety for buffering) + double-buffered
    # streamed x/out tiles + headroom, capped at v7x's 64 MiB physical VMEM.
    weight_bytes = (K * N + N * N + 2 * N) * itemsize
    stream_bytes = 2 * 2 * tb * (K + N) * itemsize
    vmem_limit = int(min(64 * 1024 * 1024,
                         max(8 * 1024 * 1024,
                             2 * weight_bytes + stream_bytes + (2 << 20))))

    cost = pl.CostEstimate(
        flops=2 * Bp * K * N + 2 * Bp * N * N + 4 * Bp * N,
        transcendentals=Bp * N,
        bytes_accessed=(Bp * K + Bp * N) * itemsize + weight_bytes,
    )

    kernel = functools.partial(mlp_kernel,
                               use_bf16_matmul=use_bf16_matmul,
                               do_skip_connection=do_skip_connection)

    out = pl.pallas_call(
        kernel,
        out_shape=jax.ShapeDtypeStruct((Bp, N), dt),
        grid=grid,
        in_specs=[
            pl.BlockSpec((tb, K), lambda i: (i, 0)),   # x: streamed batch tiles
            pl.BlockSpec((K, N), lambda i: (0, 0)),    # W1: resident
            pl.BlockSpec((1, N), lambda i: (0, 0)),    # b1: resident
            pl.BlockSpec((N, N), lambda i: (0, 0)),    # W2: resident
            pl.BlockSpec((1, N), lambda i: (0, 0)),    # b2: resident
        ],
        out_specs=pl.BlockSpec((tb, N), lambda i: (i, 0)),
        compiler_params=pltpu.CompilerParams(
            dimension_semantics=("parallel",),          # megacore-shard batch tiles
            vmem_limit_bytes=vmem_limit,
        ),
        cost_estimate=cost,
    )(x_p, w1_p, b1_p, w2_p, b2_p)

    return out[:B, :hidden]


def init_params(key, in_dim, hidden_dim, dtype=jnp.float32):
    # Deterministic init mimicking nn.Linear (uniform +/- 1/sqrt(fan_in)).
    k1, k2, k3, k4 = jax.random.split(key, 4)
    bound1 = 1.0 / (in_dim ** 0.5)
    bound2 = 1.0 / (hidden_dim ** 0.5)
    w1 = jax.random.uniform(k1, (in_dim, hidden_dim), dtype, -bound1, bound1)
    b1 = jax.random.uniform(k2, (1, hidden_dim), dtype, -bound1, bound1)
    w2 = jax.random.uniform(k3, (hidden_dim, hidden_dim), dtype, -bound2, bound2)
    b2 = jax.random.uniform(k4, (1, hidden_dim), dtype, -bound2, bound2)
    return w1, b1, w2, b2


if __name__ == "__main__":
    key = jax.random.PRNGKey(0)
    kx, kp = jax.random.split(key)

    batch, in_dim, hidden_dim = 8, 32, 32
    x = jax.random.normal(kx, (batch, in_dim), jnp.float32)
    w1, b1, w2, b2 = init_params(kp, in_dim, hidden_dim)

    # Pure-JAX reference (eval-mode dropout = identity, skip connection on).
    h_ref = x @ w1 + b1
    ref = jnp.tanh(h_ref) @ w2 + b2 + h_ref

    # f32-operand path: bit-comparable to the PyTorch module's f32 numerics.
    out_f32 = jax.block_until_ready(
        mlp_forward(x, w1, b1, w2, b2, use_bf16_matmul=False))
    assert out_f32.shape == (batch, hidden_dim)
    assert jnp.allclose(out_f32, ref, atol=1e-5, rtol=1e-5)

    # bf16-operand perf path (v6e/v7x MXU throughput), f32 accumulation.
    out_bf16 = jax.block_until_ready(
        mlp_forward(x, w1, b1, w2, b2, use_bf16_matmul=True))
    assert out_bf16.shape == (batch, hidden_dim)
    assert jnp.allclose(out_bf16, ref, atol=5e-2, rtol=5e-2)

    print("KERNEL_OK")
</pallas_src>

<mosaic_0001>
module attributes {stable_mosaic.version = 11 : i64} {
  func.func @mlp_kernel(%arg0: i32, %arg1: memref<8x128xf32, #tpu.memory_space<vmem>>, %arg2: memref<128x128xf32, #tpu.memory_space<vmem>>, %arg3: memref<1x128xf32, #tpu.memory_space<vmem>>, %arg4: memref<128x128xf32, #tpu.memory_space<vmem>>, %arg5: memref<1x128xf32, #tpu.memory_space<vmem>>, %arg6: memref<8x128xf32, #tpu.memory_space<vmem>>) attributes {dimension_semantics = [#tpu.dimension_semantics<parallel>], iteration_bounds = array<i64: 1>, scalar_prefetch = 0 : i64, scratch_operands = 0 : i64, tpu.core_type = #tpu.core_type<tc>, window_params = [{transform_indices = @transform_0, window_bounds = array<i64: 8, 128>}, {pipeline_mode = #tpu.pipeline_mode<synchronous>, transform_indices = @transform_1, window_bounds = array<i64: 128, 128>}, {pipeline_mode = #tpu.pipeline_mode<synchronous>, transform_indices = @transform_2, window_bounds = array<i64: 1, 128>}, {pipeline_mode = #tpu.pipeline_mode<synchronous>, transform_indices = @transform_3, window_bounds = array<i64: 128, 128>}, {pipeline_mode = #tpu.pipeline_mode<synchronous>, transform_indices = @transform_4, window_bounds = array<i64: 1, 128>}, {transform_indices = @transform_5, window_bounds = array<i64: 8, 128>}]} {
    %c0 = arith.constant 0 : index
    %c0_0 = arith.constant 0 : index
    %0 = vector.load %arg1[%c0, %c0_0] : memref<8x128xf32, #tpu.memory_space<vmem>>, vector<8x128xf32>
    %c0_1 = arith.constant 0 : index
    %c0_2 = arith.constant 0 : index
    %1 = vector.load %arg2[%c0_1, %c0_2] : memref<128x128xf32, #tpu.memory_space<vmem>>, vector<128x128xf32>
    %c0_3 = arith.constant 0 : index
    %c0_4 = arith.constant 0 : index
    %2 = vector.load %arg4[%c0_3, %c0_4] : memref<128x128xf32, #tpu.memory_space<vmem>>, vector<128x128xf32>
    %cst = arith.constant dense<0.000000e+00> : vector<8x128xf32>
    %3 = tpu.matmul %0, %1, %cst {dimension_numbers = #tpu.dot_dimension_numbers<[1], [0], [0], [1], [0, 0, 1, 1], [], []>} : vector<8x128xf32>, vector<128x128xf32>, vector<8x128xf32> -> vector<8x128xf32>
    %c0_5 = arith.constant 0 : index
    %c0_6 = arith.constant 0 : index
    %4 = vector.load %arg3[%c0_5, %c0_6] : memref<1x128xf32, #tpu.memory_space<vmem>>, vector<1x128xf32>
    %5 = vector.broadcast %4 : vector<1x128xf32> to vector<8x128xf32>
    %6 = arith.addf %3, %5 : vector<8x128xf32>
    %7 = math.tanh %6 : vector<8x128xf32>
    %cst_7 = arith.constant dense<0.000000e+00> : vector<8x128xf32>
    %8 = tpu.matmul %7, %2, %cst_7 {dimension_numbers = #tpu.dot_dimension_numbers<[1], [0], [0], [1], [0, 0, 1, 1], [], []>} : vector<8x128xf32>, vector<128x128xf32>, vector<8x128xf32> -> vector<8x128xf32>
    %c0_8 = arith.constant 0 : index
    %c0_9 = arith.constant 0 : index
    %9 = vector.load %arg5[%c0_8, %c0_9] : memref<1x128xf32, #tpu.memory_space<vmem>>, vector<1x128xf32>
    %10 = vector.broadcast %9 : vector<1x128xf32> to vector<8x128xf32>
    %11 = arith.addf %8, %10 : vector<8x128xf32>
    %12 = arith.addf %11, %6 : vector<8x128xf32>
    %c0_10 = arith.constant 0 : index
    %c0_11 = arith.constant 0 : index
    %13 = vector.load %arg6[%c0_10, %c0_11] : memref<8x128xf32, #tpu.memory_space<vmem>>, vector<8x128xf32>
    tpu.vector_store %arg6[%c0_10, %c0_11], %12 {strides = array<i32>} : memref<8x128xf32, #tpu.memory_space<vmem>>, vector<8x128xf32>,
    return
  }
  func.func @transform_0(%arg0: i32) -> (i32, i32) {
    %c0_i32 = arith.constant 0 : i32
    %c0_i32_0 = arith.constant 0 : i32
    return %arg0, %c0_i32 : i32, i32
  }
  func.func @transform_1(%arg0: i32) -> (i32, i32) {
    %c0_i32 = arith.constant 0 : i32
    %c0_i32_0 = arith.constant 0 : i32
    %c0_i32_1 = arith.constant 0 : i32
    return %c0_i32, %c0_i32_0 : i32, i32
  }
  func.func @transform_2(%arg0: i32) -> (i32, i32) {
    %c0_i32 = arith.constant 0 : i32
    %c0_i32_0 = arith.constant 0 : i32
    %c0_i32_1 = arith.constant 0 : i32
    return %c0_i32, %c0_i32_0 : i32, i32
  }
  func.func @transform_3(%arg0: i32) -> (i32, i32) {
    %c0_i32 = arith.constant 0 : i32
    %c0_i32_0 = arith.constant 0 : i32
    %c0_i32_1 = arith.constant 0 : i32
    return %c0_i32, %c0_i32_0 : i32, i32
  }
  func.func @transform_4(%arg0: i32) -> (i32, i32) {
    %c0_i32 = arith.constant 0 : i32
    %c0_i32_0 = arith.constant 0 : i32
    %c0_i32_1 = arith.constant 0 : i32
    return %c0_i32, %c0_i32_0 : i32, i32
  }
  func.func @transform_5(%arg0: i32) -> (i32, i32) {
    %c0_i32 = arith.constant 0 : i32
    %c0_i32_0 = arith.constant 0 : i32
    return %arg0, %c0_i32 : i32, i32
  }
}

</mosaic_0001>

<bundles_post_ra>
// kernel: tpu_custom_call.1
= control target key start
LH: loop header
LB: loop body
LE: loop exit
PB: predicated region body
PF: predicated region fallthrough
CT: control target
= control target key end

     0   :  { %10 = vsyncpa [#allocation3], 0  ;;  %s558_s0 = inlined_call_operand.hbm [shape: f32[8,128], index: 0, kind: input, shape index: {}]   ;;  %s559_s1 = inlined_call_operand.hbm [shape: f32[128,128], index: 1, kind: input, shape index: {}]   ;;  %s560_s2 = inlined_call_operand.vmem [shape: f32[1,128], index: 2, kind: input, shape index: {}]   ;;  %s561_s3 = inlined_call_operand.hbm [shape: f32[128,128], index: 3, kind: input, shape index: {}]   ;;  %s562_s4 = inlined_call_operand.vmem [shape: f32[1,128], index: 4, kind: input, shape index: {}]   ;;  %s563_s5 = inlined_call_operand.hbm [shape: f32[8,128], index: 5, kind: output, shape index: {}]  }
   0x1   :  { %11 = vsyncpa [#allocation6], 0 }
   0x2   :  { %12 = vsyncpa [#allocation4], 0  ;;  %s468_s18 = smov [#allocation5]  }
   0x3   :  { %s28_s19 = sshll.u32 %s468_s18, 4  ;;  %s29_s19 = int_to_ptr.vmem [resolvable:$true] %s28_s19 }
   0x4   :  { %s390_s20 = scalar_lea.vmem %s29_s19, 2048  ;;  %p395_p1 = scmp.lt.s32.totalorder %s29_s19, %s29_s19 }
   0x5   :  { %p391_p0 = scmp.ne.s32.totalorder %s29_s19, %s390_s20  ;;  %p396_p2 = scmp.lt.s32.totalorder %s390_s20, %s390_s20 }
   0x7   :  { %p397_p3 = por %p396_p2, %p395_p1 }
   0x9   :  { %p398_p4 = pnand %p397_p3, %p391_p0 }
   0xb   :  { %401 = shalt.err (!%p398_p4)
}
   0xc   :  { %s469_s21 = smov 128   ;;  %s470_s22 = smov 8  }
   0xd   :  { %34 = dma.hbm_to_vmem [thread:$0]  %s559_s1, 2048, %s29_s19, [#allocation6], %s469_s21, %s469_s21, %s470_s22  }
   0xe   :  { %s471_s25 = smov [#allocation2]   ;;  %s472_s27 = smov [#allocation7]  }
   0xf   :  { %s19_s26 = sshll.u32 %s471_s25, 4  ;;  %s42_s28 = sshll.u32 %s472_s27, 4  ;;  %s20_s26 = int_to_ptr.vmem [resolvable:$true] %s19_s26  ;;  %s43_s28 = int_to_ptr.vmem [resolvable:$true] %s42_s28 }
  0x10   :  { %s410_s29 = scalar_lea.vmem %s20_s26, 128  ;;  %p415_p6 = scmp.lt.s32.totalorder %s20_s26, %s20_s26 }
  0x11   :  { %p411_p5 = scmp.ne.s32.totalorder %s20_s26, %s410_s29  ;;  %p416_p7 = scmp.lt.s32.totalorder %s410_s29, %s410_s29 }
  0x13   :  { %p417_p8 = por %p416_p7, %p415_p6 }
  0x15   :  { %p418_p9 = pnand %p417_p8, %p411_p5 }
  0x17   :  { %421 = shalt.err (!%p418_p9)
}
  0x18   :  { %22 = dma.hbm_to_vmem [thread:$0]  %s558_s0, 128, %s20_s26, [#allocation3]  }
  0x19   :  { %s430_s7 = scalar_lea.vmem %s43_s28, 2048  ;;  %p435_p11 = scmp.lt.s32.totalorder %s43_s28, %s43_s28 }
  0x1a   :  { %p431_p10 = scmp.ne.s32.totalorder %s43_s28, %s430_s7  ;;  %p436_p12 = scmp.lt.s32.totalorder %s430_s7, %s430_s7 }
  0x1c   :  { %p437_p13 = por %p436_p12, %p435_p11 }
  0x1e   :  { %p438_p0 = pnand %p437_p13, %p431_p10 }
  0x20   :  { %441 = shalt.err (!%p438_p0)
}
  0x21   :  { %48 = dma.hbm_to_vmem [thread:$0]  %s561_s3, 2048, %s43_s28, [#allocation6], %s469_s21, %s469_s21, %s470_s22  }
  0x22   :  { %462 = dma.done.wait [#allocation3], 128  }
  0x23   :  { %463 = vsyncadd [#allocation3], 4294967168 }
  0x24   :  { %464 = dma.done.wait [#allocation6], 4096  }
  0x25   :  { %465 = vsyncadd [#allocation6], 4294963200  ;;  %v473_v0 = vmov 0.0   ;;  %vm474_vm0 = vmmov 0   ;;  %v76_v1 = vld [vmem:[#allocation5 + $0x78] sm:$0xff]  ;;  %v75_v2 = vld [vmem:[#allocation5 + $0x70] sm:$0xff] }
  0x26   :  { %302 = vmatprep.subr.mxu0 %v473_v0  ;;  %334 = vmatprep.mubr.msk.f32.mxu0 %vm474_vm0, %v473_v0  ;;  %v74_v3 = vld [vmem:[#allocation5 + $0x68] sm:$0xff]  ;;  %v73_v4 = vld [vmem:[#allocation5 + $0x60] sm:$0xff]  ;;  %v92_v5 = vld [vmem:[#allocation7 + $0x78] sm:$0xff]  ;;  %s475_s11 = smov [#allocation8]  }
  0x27   :  { %337 = vmatprep.subr.mxu1 %v473_v0  ;;  %369 = vmatprep.mubr.msk.f32.mxu1 %vm474_vm0, %v473_v0  ;;  %v72_v6 = vld [vmem:[#allocation5 + $0x58] sm:$0xff]  ;;  %v91_v7 = vld [vmem:[#allocation7 + $0x70] sm:$0xff]  ;;  %v90_v8 = vld [vmem:[#allocation7 + $0x68] sm:$0xff]  ;;  %s256_s12 = sshll.u32 %s475_s11, 4  ;;  %s257_s12 = int_to_ptr.vmem [resolvable:$true] %s256_s12 }
  0x28   :  { %303 = vmatpush3.msra.mxu0 %v76_v1  ;;  %338 = vmatpush3.msra.mxu1 %v92_v5  ;;  %v71_v9 = vld [vmem:[#allocation5 + $0x50] sm:$0xff]  ;;  %v89_v10 = vld [vmem:[#allocation7 + $0x60] sm:$0xff]  ;;  %v70_v11 = vld [vmem:[#allocation5 + $0x48] sm:$0xff]  ;;  %s442_s13 = scalar_lea.vmem %s257_s12, 128  ;;  %p447_p2 = scmp.lt.s32.totalorder %s257_s12, %s257_s12 }
  0x29   :  { %304 = vmatprep.subr.mxu0 %v473_v0  ;;  %339 = vmatprep.subr.mxu1 %v473_v0  ;;  %v88_v12 = vld [vmem:[#allocation7 + $0x58] sm:$0xff]  ;;  %v69_v13 = vld [vmem:[#allocation5 + $0x40] sm:$0xff]  ;;  %v87_v14 = vld [vmem:[#allocation7 + $0x50] sm:$0xff]  ;;  %p443_p1 = scmp.ne.s32.totalorder %s257_s12, %s442_s13  ;;  %p448_p3 = scmp.lt.s32.totalorder %s442_s13, %s442_s13 }
  0x2a   :  { %305 = vmatpush3.msra.mxu0 %v75_v2  ;;  %340 = vmatpush3.msra.mxu1 %v91_v7  ;;  %v68_v15 = vld [vmem:[#allocation5 + $0x38] sm:$0xff]  ;;  %v86_v16 = vld [vmem:[#allocation7 + $0x48] sm:$0xff]  ;;  %v67_v17 = vld [vmem:[#allocation5 + $0x30] sm:$0xff] }
  0x2b   :  { %306 = vmatprep.subr.mxu0 %v473_v0  ;;  %341 = vmatprep.subr.mxu1 %v473_v0  ;;  %v66_v18 = vld [vmem:[#allocation5 + $0x28] sm:$0xff]  ;;  %v65_v19 = vld [vmem:[#allocation5 + $0x20] sm:$0xff]  ;;  %v64_v20 = vld [vmem:[#allocation5 + $0x18] sm:$0xff]  ;;  %p449_p4 = por %p448_p3, %p447_p2 }
  0x2c   :  { %307 = vmatpush3.msra.mxu0 %v74_v3  ;;  %342 = vmatpush3.msra.mxu1 %v90_v8  ;;  %v63_v21 = vld [vmem:[#allocation5 + $0x10] sm:$0xff]  ;;  %v62_v22 = vld [vmem:[#allocation5 + $0x8] sm:$0xff]  ;;  %v61_v23 = vld [vmem:[#allocation5] sm:$0xff] }
  0x2d   :  { %308 = vmatprep.subr.mxu0 %v473_v0  ;;  %343 = vmatprep.subr.mxu1 %v473_v0  ;;  %v60_v24 = vld [vmem:[#allocation2] sm:$0xff]  ;;  %v85_v25 = vld [vmem:[#allocation7 + $0x40] sm:$0xff]  ;;  %v83_v27 = vld [vmem:[#allocation7 + $0x30] sm:$0xff]  ;;  %p450_p5 = pnand %p449_p4, %p443_p1 }
  0x2e   :  { %309 = vmatpush3.msra.mxu0 %v73_v4  ;;  %344 = vmatpush3.msra.mxu1 %v89_v10  ;;  %v84_v26 = vld [vmem:[#allocation7 + $0x38] sm:$0xff]  ;;  %v82_v28 = vld [vmem:[#allocation7 + $0x28] sm:$0xff]  ;;  %v81_v29 = vld [vmem:[#allocation7 + $0x20] sm:$0xff] }
  0x2f   :  { %310 = vmatprep.subr.mxu0 %v473_v0  ;;  %345 = vmatprep.subr.mxu1 %v473_v0  ;;  %v80_v30 = vld [vmem:[#allocation7 + $0x18] sm:$0xff]  ;;  %v79_v31 = vld [vmem:[#allocation7 + $0x10] sm:$0xff]  ;;  %v78_v32 = vld [vmem:[#allocation7 + $0x8] sm:$0xff] }
  0x30   :  { %311 = vmatpush3.msra.mxu0 %v72_v6  ;;  %346 = vmatpush3.msra.mxu1 %v88_v12  ;;  %v77_v33 = vld [vmem:[#allocation7] sm:$0xff]  ;;  %v266_v34 = vld [vmem:[%s560_s2] ss:$0 sm:$0xff] }
  0x31   :  { %312 = vmatprep.subr.mxu0 %v473_v0  ;;  %347 = vmatprep.subr.mxu1 %v473_v0  ;;  %v267_v39 = vld [vmem:[%s562_s4] ss:$0 sm:$0xff] }
  0x32   :  { %313 = vmatpush3.msra.mxu0 %v71_v9  ;;  %348 = vmatpush3.msra.mxu1 %v87_v14 }
  0x33   :  { %314 = vmatprep.subr.mxu0 %v473_v0  ;;  %349 = vmatprep.subr.mxu1 %v473_v0 }
  0x34   :  { %315 = vmatpush3.msra.mxu0 %v70_v11  ;;  %350 = vmatpush3.msra.mxu1 %v86_v16 }
  0x35   :  { %316 = vmatprep.subr.mxu0 %v473_v0  ;;  %351 = vmatprep.subr.mxu1 %v473_v0 }
  0x36   :  { %317 = vmatpush3.msra.mxu0 %v69_v13  ;;  %352 = vmatpush3.msra.mxu1 %v85_v25 }
  0x37   :  { %318 = vmatprep.subr.mxu0 %v473_v0  ;;  %353 = vmatprep.subr.mxu1 %v473_v0 }
  0x38   :  { %319 = vmatpush3.msra.mxu0 %v68_v15  ;;  %354 = vmatpush3.msra.mxu1 %v84_v26 }
  0x39   :  { %320 = vmatprep.subr.mxu0 %v473_v0  ;;  %355 = vmatprep.subr.mxu1 %v473_v0 }
  0x3a   :  { %321 = vmatpush3.msra.mxu0 %v67_v17  ;;  %356 = vmatpush3.msra.mxu1 %v83_v27 }
  0x3b   :  { %322 = vmatprep.subr.mxu0 %v473_v0  ;;  %357 = vmatprep.subr.mxu1 %v473_v0 }
  0x3c   :  { %323 = vmatpush3.msra.mxu0 %v66_v18  ;;  %358 = vmatpush3.msra.mxu1 %v82_v28 }
  0x3d   :  { %324 = vmatprep.subr.mxu0 %v473_v0  ;;  %359 = vmatprep.subr.mxu1 %v473_v0 }
  0x3e   :  { %325 = vmatpush3.msra.mxu0 %v65_v19  ;;  %360 = vmatpush3.msra.mxu1 %v81_v29 }
  0x3f   :  { %326 = vmatprep.subr.mxu0 %v473_v0  ;;  %361 = vmatprep.subr.mxu1 %v473_v0 }
  0x40   :  { %327 = vmatpush3.msra.mxu0 %v64_v20  ;;  %362 = vmatpush3.msra.mxu1 %v80_v30 }
  0x41   :  { %328 = vmatprep.subr.mxu0 %v473_v0  ;;  %363 = vmatprep.subr.mxu1 %v473_v0 }
  0x42   :  { %329 = vmatpush3.msra.mxu0 %v63_v21  ;;  %364 = vmatpush3.msra.mxu1 %v79_v31 }
  0x43   :  { %330 = vmatprep.subr.mxu0 %v473_v0  ;;  %365 = vmatprep.subr.mxu1 %v473_v0 }
  0x44   :  { %331 = vmatpush3.msra.mxu0 %v62_v22  ;;  %366 = vmatpush3.msra.mxu1 %v78_v32 }
  0x45   :  { %332 = vmatprep.subr.mxu0 %v473_v0  ;;  %367 = vmatprep.subr.mxu1 %v473_v0 }
  0x46   :  { %333 = vmatpush3.msra.mxu0 %v61_v23  ;;  %368 = vmatpush3.msra.mxu1 %v77_v33 }
  0x47   :  { %335 = vmatmul.mubr.f32.vlgmr.msra.gmra.mxu0 %v60_v24 }
 0x107   :  { %v166_v35 = vpop.f32.mrf.mxu0 }
 0x108   :  { %v167_v36 = vadd.f32 %v266_v34, %v166_v35 }
 0x109   :  { %v336_v37 = vpop.f32.mrf.mxu0 }
 0x10a   :  { %380 = vtanh.f32 %v167_v36 }
 0x117   :  { %v381_v38 = vpop.eup %380 }
 0x118   :  { %370 = vmatmul.mubr.f32.vlgmr.msra.gmra.mxu1 %v381_v38 }
 0x1d8   :  { %v244_v40 = vpop.f32.mrf.mxu1 }
 0x1d9   :  { %v245_v41 = vadd.f32 %v267_v39, %v244_v40 }
 0x1da   :  { %v371_v42 = vpop.f32.mrf.mxu1 }
 0x1db   :  { %v248_v43 = vadd.f32 %v245_v41, %v167_v36 }
 0x1dd   :  { %249 = vst [vmem:[#allocation8] sm:$0xff] %v248_v43 }
 0x1de   :  { %453 = shalt.err (!%p450_p5)
}
 0x1df   :  { %259 = dma.vmem_to_hbm [thread:$0]  %s257_s12, 128, %s563_s5, [#allocation4]  }
 0x1e0   :  { %466 = dma.done.wait [#allocation4], 128  }
 0x1e1   :  { %467 = vsyncadd [#allocation4], 4294967168 }
 0x1e2   :  { %263 = vsyncpa [#allocation3], 1 }
 0x1e3   :  { %264 = vsyncpa [#allocation6], 1 }
 0x1e4   :  { %265 = vsyncpa [#allocation4], 1 }

</bundles_post_ra>
